<compile_context>
chip_gen: v7x
topology: tpu7x:2x2x1
jax: 0.10.0
libtpu: 0.0.40
codegen_flags: <defaults>
</compile_context>

<pallas_src>
import functools

import jax
import jax.numpy as jnp
from jax.experimental import pallas as pl
from jax.experimental.pallas import tpu as pltpu


def _aspect_emb_kernel(x_ref, w_ref, o_ref, *, num_asp, e_dim):
    # x_ref: (TB, num_asp)             -- batch-row tile of x
    # w_ref: (1, num_asp * e_dim)      -- flattened W, resident across steps
    # o_ref: (TB, num_asp * e_dim)     -- lane-dense flat output tile
    x = x_ref[...]                                           # (TB, num_asp)
    tb = x.shape[0]
    # Expand each aspect value across its e_dim output columns once per tile
    # (broadcast + minor-dim merge == jnp.repeat(x, e_dim, axis=1)).
    x_wide = jnp.broadcast_to(x[:, :, None], (tb, num_asp, e_dim))
    x_wide = x_wide.reshape(tb, num_asp * e_dim)             # (TB, out_cols)
    # Single full-width VPU multiply (sublane-broadcast of the W row) and one
    # dense 128-lane store of the whole tile.
    o_ref[...] = (x_wide * w_ref[...]).astype(o_ref.dtype)


def aspect_emb(x, W, *, out_dtype=None, target_block_bytes=4 * 1024 * 1024):
    """x: (B, num_asp), W: (num_asp, e_dim) -> (B, num_asp, e_dim)."""
    B, num_asp = x.shape
    num_asp_w, e_dim = W.shape
    assert num_asp == num_asp_w, "x / W aspect dims disagree"
    out_cols = num_asp * e_dim
    if out_dtype is None:
        out_dtype = jnp.result_type(x.dtype, W.dtype)
    itemsize = jnp.dtype(out_dtype).itemsize

    # Sublane multiple for the output dtype (f32 -> 8, bf16 -> 16, int8 -> 32).
    sub = 8 * max(1, 4 // itemsize)

    # Batch tile: ~target_block_bytes of output per grid step, rounded down to
    # a sublane multiple.  Default 4 MiB keeps the double-buffered working set
    # (~3x the tile, incl. the 16x lane-padded x buffers) under the 16 MiB v5e
    # scoped-VMEM default; raise target (+ vmem_limit_bytes) on v6e/v7x.
    row_bytes = out_cols * itemsize
    tb = (int(target_block_bytes) // max(row_bytes, 1)) // sub * sub
    tb = max(sub, tb)
    if tb >= B:
        if B >= 2 * sub:
            # Keep >= 2 grid steps so both v7x TensorCores get work.
            tb = pl.cdiv(pl.cdiv(B, 2), sub) * sub
        else:
            tb = B  # single full-extent block (always a legal block shape)
    grid = (pl.cdiv(B, tb),)

    # Pre-flatten W to a lane-dense (1, out_cols) row (contiguous -> free).
    w_flat = W.reshape(1, out_cols)

    kernel = functools.partial(_aspect_emb_kernel, num_asp=num_asp, e_dim=e_dim)

    out_flat = pl.pallas_call(
        kernel,
        out_shape=jax.ShapeDtypeStruct((B, out_cols), out_dtype),
        grid_spec=pltpu.PrefetchScalarGridSpec(
            num_scalar_prefetch=0,
            grid=grid,
            in_specs=[
                # TB batch rows of x per step.
                pl.BlockSpec((tb, num_asp), lambda i: (i, 0)),
                # Flattened W resident across all steps (constant block index).
                pl.BlockSpec((1, out_cols), lambda i: (0, 0)),
            ],
            out_specs=pl.BlockSpec((tb, out_cols), lambda i: (i, 0)),
        ),
        compiler_params=pltpu.CompilerParams(
            # Independent batch tiles -> shard grid across TCs (v7x megacore).
            dimension_semantics=("parallel",),
        ),
    )(x, w_flat)

    # Same contiguous memory layout -> free reshape back to the 3-D output.
    return out_flat.reshape(B, num_asp, e_dim)


def _reference(x, W):
    return x[:, :, None] * W[None, :, :]


if __name__ == "__main__":
    # Small shapes consistent with Aspect_emb(num_asp, e_dim).
    batch, num_asp, e_dim = 2, 8, 32

    key = jax.random.PRNGKey(0)
    kx, kw, kx2 = jax.random.split(key, 3)

    W = jax.random.normal(kw, (num_asp, e_dim), dtype=jnp.float32)
    x = jax.random.normal(kx, (batch, num_asp), dtype=jnp.float32)

    out = jax.block_until_ready(aspect_emb(x, W))
    ref = _reference(x, W)
    assert out.shape == (batch, num_asp, e_dim)
    assert jnp.allclose(out, ref, atol=1e-6), "mismatch vs reference (small)"

    # Also exercise the batch-tiled multi-step grid path:
    # B=48 with a forced 16 KiB target tile -> 16-row blocks, 3 grid steps.
    x2 = jax.random.normal(kx2, (48, num_asp), dtype=jnp.float32)
    out2 = jax.block_until_ready(aspect_emb(x2, W, target_block_bytes=16 * 1024))
    assert jnp.allclose(out2, _reference(x2, W), atol=1e-6), "mismatch (tiled path)"

    print("KERNEL_OK")
</pallas_src>

<mosaic_0001>
module attributes {stable_mosaic.version = 11 : i64} {
  func.func @_aspect_emb_kernel(%arg0: i32, %arg1: memref<2x8xf32, #tpu.memory_space<vmem>>, %arg2: memref<1x256xf32, #tpu.memory_space<vmem>>, %arg3: memref<2x256xf32, #tpu.memory_space<vmem>>) attributes {dimension_semantics = [#tpu.dimension_semantics<parallel>], iteration_bounds = array<i64: 1>, scalar_prefetch = 0 : i64, scratch_operands = 0 : i64, tpu.core_type = #tpu.core_type<tc>, window_params = [{transform_indices = @transform_0, window_bounds = array<i64: 2, 8>}, {pipeline_mode = #tpu.pipeline_mode<synchronous>, transform_indices = @transform_1, window_bounds = array<i64: 1, 256>}, {transform_indices = @transform_2, window_bounds = array<i64: 2, 256>}]} {
    %c0 = arith.constant 0 : index
    %c0_0 = arith.constant 0 : index
    %0 = vector.load %arg1[%c0, %c0_0] : memref<2x8xf32, #tpu.memory_space<vmem>>, vector<2x8xf32>
    %1 = vector.shape_cast %0 : vector<2x8xf32> to vector<2x8x1xf32>
    %2 = vector.shape_cast %1 : vector<2x8x1xf32> to vector<2x8x1xf32>
    %3 = vector.broadcast %2 : vector<2x8x1xf32> to vector<2x8x32xf32>
    %4 = vector.shape_cast %3 : vector<2x8x32xf32> to vector<2x256xf32>
    %c0_1 = arith.constant 0 : index
    %c0_2 = arith.constant 0 : index
    %5 = vector.load %arg2[%c0_1, %c0_2] : memref<1x256xf32, #tpu.memory_space<vmem>>, vector<1x256xf32>
    %6 = vector.broadcast %5 : vector<1x256xf32> to vector<2x256xf32>
    %7 = arith.mulf %4, %6 : vector<2x256xf32>
    %c0_3 = arith.constant 0 : index
    %c0_4 = arith.constant 0 : index
    %8 = vector.load %arg3[%c0_3, %c0_4] : memref<2x256xf32, #tpu.memory_space<vmem>>, vector<2x256xf32>
    tpu.vector_store %arg3[%c0_3, %c0_4], %7 {strides = array<i32>} : memref<2x256xf32, #tpu.memory_space<vmem>>, vector<2x256xf32>,
    return
  }
  func.func @transform_0(%arg0: i32) -> (i32, i32) {
    %c0_i32 = arith.constant 0 : i32
    %c0_i32_0 = arith.constant 0 : i32
    return %arg0, %c0_i32 : i32, i32
  }
  func.func @transform_1(%arg0: i32) -> (i32, i32) {
    %c0_i32 = arith.constant 0 : i32
    %c0_i32_0 = arith.constant 0 : i32
    %c0_i32_1 = arith.constant 0 : i32
    return %c0_i32, %c0_i32_0 : i32, i32
  }
  func.func @transform_2(%arg0: i32) -> (i32, i32) {
    %c0_i32 = arith.constant 0 : i32
    %c0_i32_0 = arith.constant 0 : i32
    return %arg0, %c0_i32 : i32, i32
  }
}

</mosaic_0001>

<bundles_post_ra>
// kernel: tpu_custom_call.1
= control target key start
LH: loop header
LB: loop body
LE: loop exit
PB: predicated region body
PF: predicated region fallthrough
CT: control target
= control target key end

     0   :  { %7 = vsyncpa [#allocation3], 0  ;;  %s286_s0 = inlined_call_operand.hbm [shape: f32[2,8], index: 0, kind: input, shape index: {}]   ;;  %s287_s1 = inlined_call_operand.vmem [shape: f32[1,256], index: 1, kind: input, shape index: {}]   ;;  %s288_s2 = inlined_call_operand.hbm [shape: f32[2,256], index: 2, kind: output, shape index: {}]  }
   0x1   :  { %8 = vsyncpa [#allocation4], 0  ;;  %s236_s9 = smov [#allocation2]   ;;  %s188_s13 = scalar_lea.hbm %s286_s0, 32 }
   0x2   :  { %s15_s10 = sshll.u32 %s236_s9, 4  ;;  %p189_p0 = scmp.ne.s32.totalorder %s286_s0, %s188_s13  ;;  %s16_s10 = int_to_ptr.vmem [resolvable:$true] %s15_s10 }
   0x3   :  { %p192_p1 = scmp.lt.u32.totalorder %s188_s13, %s286_s0 }
   0x5   :  { %p194_p2 = pnand %p192_p1, %p189_p0 }
   0x7   :  { %197 = shalt.err (!%p194_p2)
}
   0x8   :  { %s198_s18 = scalar_lea.vmem %s16_s10, 32  ;;  %p203_p4 = scmp.lt.s32.totalorder %s16_s10, %s16_s10 }
   0x9   :  { %p199_p3 = scmp.ne.s32.totalorder %s16_s10, %s198_s18  ;;  %p204_p5 = scmp.lt.s32.totalorder %s198_s18, %s198_s18 }
   0xb   :  { %p205_p6 = por %p204_p5, %p203_p4 }
   0xd   :  { %p206_p7 = pnand %p205_p6, %p199_p3 }
   0xf   :  { %209 = shalt.err (!%p206_p7)
}
  0x10   :  { %18 = dma.hbm_to_vmem [thread:$0]  %s286_s0, 32, %s16_s10, [#allocation3]  }
  0x11   :  { %232 = dma.done.wait [#allocation3], 32  }
  0x12   :  { %233 = vsyncadd [#allocation3], 4294967264  ;;  %v25_v0 = vlaneseq  ;;  %v24_v4 = vld [vmem:[#allocation2] sm:$0x3]  ;;  %v237_v7 = vmov 1983009808  }
  0x13   :  { %v41_v8 = vunpack.c.l.s4 %v237_v7  ;;  %v238_v9 = vmov 1934713408   ;;  %v239_v17 = vmov 0.0   ;;  %s240_s0 = smov 64   ;;  %s241_s21 = smov 32   ;;  %vm129_vm0 = vcmask 261120  }
  0x14   :  { %v26_v1 = vshrl.u32 %v25_v0, 7  ;;  %v72_v10 = vunpack.c.l.s4 %v238_v9  ;;  %s242_s22 = smov 96   ;;  %vm131_vm1 = vcmask 523264   ;;  %v138_v40 = vld [vmem:[%s287_s1] sm:$0x3]  ;;  %vm133_vm2 = vcmask 785408  }
  0x15   :  { %v42_v11 = vunpack.c.0.s8 %v41_v8  ;;  %s243_s25 = smov [#allocation5]  }
  0x16   :  { %v27_v2 = vsub.s32 0, %v26_v1  ;;  %v34_v3 = vsub.s32 1, %v26_v1  ;;  %v73_v13 = vunpack.c.0.s8 %v72_v10  ;;  %s170_s26 = sshll.u32 %s243_s25, 4  ;;  %s171_s26 = int_to_ptr.vmem [resolvable:$true] %s170_s26 }
  0x17   :  { %v45_v14 = vsub.s32 %v42_v11, %v26_v1  ;;  %s210_s27 = scalar_lea.vmem %s171_s26, 64  ;;  %p215_p9 = scmp.lt.s32.totalorder %s171_s26, %s171_s26 }
  0x18   :  { %v28_v5 = vrot.slane %v24_v4, %v27_v2  ;;  %v35_v6 = vrot.slane %v24_v4, %v34_v3  ;;  %v76_v16 = vsub.s32 %v73_v13, %v26_v1  ;;  %v143_v45 = vrot.slane %v138_v40, %v27_v2  ;;  %p211_p8 = scmp.ne.s32.totalorder %s171_s26, %s210_s27  ;;  %p216_p10 = scmp.lt.s32.totalorder %s210_s27, %s210_s27 }
  0x19   :  { %v147_v46 = vrot.slane %v138_v40, %v34_v3 }
  0x1a   :  { %30 = vbcast.lane.b32.xlu0 %v28_v5, 256  ;;  %p217_p11 = por %p216_p10, %p215_p9 }
  0x1c   :  { %p218_p12 = pnand %p217_p11, %p211_p8 }
  0x1e   :  { %37 = vbcast.lane.b32.xlu0 %v35_v6, 256 }
  0x8c   :  { %v31_v12 = vpop.permute.xlu0 %30 }
  0x8d   :  { %v39_v18 = vcombine.high %v31_v12, %v239_v17  ;;  %v46_v19 = vrot.slane %v31_v12, %v45_v14 }
  0x8f   :  { %v53_v25 = vrot.slane %v39_v18, %v45_v14 }
  0x90   :  { %v38_v15 = vpop.permute.xlu0 %37 }
  0x91   :  { %v54_v20 = vcombine.high %v38_v15, %v239_v17  ;;  %v61_v21 = vrot.slane %v38_v15, %v45_v14 }
  0x93   :  { %v68_v22 = vrot.slane %v54_v20, %v45_v14  ;;  %v69_v23 = vcombine.low %v46_v19, %v61_v21  ;;  %v70_v24 = vcombine.high %v46_v19, %v61_v21 }
  0x95   :  { %v84_v26 = vrot.slane %v70_v24, %v76_v16  ;;  %v77_v27 = vrot.slane %v69_v23, %v76_v16  ;;  %v85_v28 = vcombine.low %v53_v25, %v68_v22  ;;  %v86_v29 = vcombine.high %v53_v25, %v68_v22 }
  0x97   :  { %110 = vrot.lane.b32.xlu0 %v84_v26, %s240_s0  ;;  %v101_v30 = vcombine.high %v77_v27, %v239_v17  ;;  %v102_v31 = vcombine.high %v84_v26, %v239_v17  ;;  %v100_v32 = vrot.slane %v86_v29, %v76_v16  ;;  %v93_v33 = vrot.slane %v85_v28, %v76_v16 }
  0x99   :  { %106 = vrot.lane.b32.xlu1 %v101_v30, %s241_s21  ;;  %v103_v34 = vcombine.high %v93_v33, %v239_v17  ;;  %v104_v35 = vcombine.high %v100_v32, %v239_v17 }
  0x9b   :  { %114 = vrot.lane.b32.xlu0 %v102_v31, %s242_s22 }
  0x9d   :  { %122 = vrot.lane.b32.xlu1 %v100_v32, %s240_s0 }
  0xa1   :  { %118 = vrot.lane.b32.xlu1 %v103_v34, %s241_s21 }
  0xa5   :  { %126 = vrot.lane.b32.xlu1 %v104_v35, %s242_s22 }
 0x109   :  { %v111_v37 = vpop.permute.xlu0 %110 }
 0x10b   :  { %v107_v36 = vpop.permute.xlu1 %106 }
 0x10c   :  { %v130_v39 = vsel %vm129_vm0, %v77_v27, %v107_v36 }
 0x10d   :  { %v115_v41 = vpop.permute.xlu0 %114  ;;  %v132_v42 = vsel %vm131_vm1, %v130_v39, %v111_v37 }
 0x10e   :  { %v134_v47 = vsel %vm133_vm2, %v132_v42, %v115_v41 }
 0x10f   :  { %v123_v38 = vpop.permute.xlu1 %122  ;;  %v150_v51 = vmul.f32 %v143_v45, %v134_v47 }
 0x113   :  { %v119_v43 = vpop.permute.xlu1 %118 }
 0x114   :  { %v135_v44 = vsel %vm129_vm0, %v93_v33, %v119_v43 }
 0x115   :  { %v136_v48 = vsel %vm131_vm1, %v135_v44, %v123_v38 }
 0x117   :  { %v127_v49 = vpop.permute.xlu1 %126 }
 0x118   :  { %v137_v50 = vsel %vm133_vm2, %v136_v48, %v127_v49 }
 0x119   :  { %v151_v52 = vmul.f32 %v147_v46, %v137_v50 }
 0x11b   :  { %v154_v53 = vcombine.low %v150_v51, %v151_v52 }
 0x11d   :  { %179 = vst.sshfl [vmem:[#allocation5] sm:$0x33 pattern:$0x76325410] %v154_v53 }
 0x11e   :  { %221 = shalt.err (!%p218_p12)
}
 0x11f   :  { %s222_s29 = scalar_lea.hbm %s288_s2, 64 }
 0x120   :  { %p223_p13 = scmp.ne.s32.totalorder %s288_s2, %s222_s29  ;;  %p226_p0 = scmp.lt.u32.totalorder %s222_s29, %s288_s2 }
 0x122   :  { %p228_p1 = pnand %p226_p0, %p223_p13 }
 0x124   :  { %231 = shalt.err (!%p228_p1)
}
 0x125   :  { %173 = dma.vmem_to_hbm [thread:$0]  %s171_s26, 64, %s288_s2, [#allocation4]  }
 0x126   :  { %234 = dma.done.wait [#allocation4], 64  }
 0x127   :  { %235 = vsyncadd [#allocation4], 4294967232 }
 0x128   :  { %177 = vsyncpa [#allocation3], 1 }
 0x129   :  { %178 = vsyncpa [#allocation4], 1 }

</bundles_post_ra>
